<compile_context>
chip_gen: v5e
topology: v5e:2x2
jax: 0.10.0
libtpu: 0.0.40
codegen_flags: <defaults>
</compile_context>

<pallas_src>
from typing import NamedTuple

import jax
import jax.numpy as jnp
from jax.experimental import pallas as pl
from jax.experimental.pallas import tpu as pltpu


# ---------------------------------------------------------------------------
# Problem sizes (consistent with GCNCritic.__init__):
#   feature_num * ip_node_num = v_net input dim
# ---------------------------------------------------------------------------
B = 2              # demo batch
N_NODES = 8        # ip_node_num
F_IN = 4           # raw observation feature dim per node
F_OUT = 16         # feature_num (GCN output feature dim per node)
HIDDEN = (32, 32)  # hidden_sizes; v_net = [F_OUT*N_NODES, 32, 32, 1], tanh


def _ceil_to(x, m):
    return -(-x // m) * m


def _align8(x):
    return _ceil_to(x, 8)


class _Layout(NamedTuple):
    lanes: int    # padded layer width (>=128, multiple of 128)
    k_in: int     # padded GCN-input rows/cols (N*F_in + ones col, aligned to 8)
    nf_in: int    # N*F_in
    off_wg: int
    off_w1: int
    off_w2: int
    off_w3: int
    off_b: int
    n_rows: int


def _make_layout(n_nodes, f_in, f_out, h1_dim, h2_dim):
    flat_dim = n_nodes * f_out
    lanes = _ceil_to(max(flat_dim, h1_dim, h2_dim, 128), 128)
    nf_in = n_nodes * f_in
    k_in = _align8(nf_in + 1)                  # +1 ones column (folded GCN bias)
    off_wg = 0
    off_w1 = _align8(off_wg + k_in)
    off_w2 = off_w1 + lanes
    off_w3 = off_w2 + lanes
    off_b = off_w3 + lanes
    n_rows = _align8(off_b + 3)                # b1, b2, b3 rows
    return _Layout(lanes, k_in, nf_in, off_wg, off_w1, off_w2, off_w3, off_b, n_rows)


def pack_params(adj, params):
    """Parameter prep, done ONCE per weight update (hoisted out of forward).

    Returns (packed [n_rows, lanes] f32 buffer, layout).
    """
    wg, bg, w1, b1, w2, b2, w3, b3 = params
    n_nodes = adj.shape[0]
    f_in, f_out = wg.shape
    flat_dim = n_nodes * f_out
    h1_dim, h2_dim = w1.shape[1], w2.shape[1]
    L = _make_layout(n_nodes, f_in, f_out, h1_dim, h2_dim)

    # GCN fused into one 2D matmul with the bias folded in as an extra row:
    #   relu(A @ X @ Wg + bg).reshape(B, N*F_out)
    #     == relu([X.reshape(B,N*F_in) | 1] @ [[kron(A.T, Wg)], [tile(bg, N)]])
    w_gcn = jnp.kron(adj.T.astype(jnp.float32), wg.astype(jnp.float32))   # [N*F_in, N*F_out]
    bg_row = jnp.tile(jnp.reshape(bg, (1, f_out)).astype(jnp.float32), (1, n_nodes))
    w_gcn_aug = jnp.concatenate([w_gcn, bg_row], axis=0)                  # [N*F_in+1, flat]

    packed = jnp.zeros((L.n_rows, L.lanes), jnp.float32)
    packed = packed.at[L.off_wg:L.off_wg + w_gcn_aug.shape[0], :flat_dim].set(w_gcn_aug)
    packed = packed.at[L.off_w1:L.off_w1 + flat_dim, :h1_dim].set(w1.astype(jnp.float32))
    packed = packed.at[L.off_w2:L.off_w2 + h1_dim, :h2_dim].set(w2.astype(jnp.float32))
    # Final layer: lane-tiled so the last matmul is full 128-lane width.
    packed = packed.at[L.off_w3:L.off_w3 + h2_dim, :].set(
        jnp.tile(w3.astype(jnp.float32), (1, L.lanes)))
    packed = packed.at[L.off_b + 0, :h1_dim].set(jnp.reshape(b1, (-1,)).astype(jnp.float32))
    packed = packed.at[L.off_b + 1, :h2_dim].set(jnp.reshape(b2, (-1,)).astype(jnp.float32))
    packed = packed.at[L.off_b + 2, :].set(
        jnp.tile(jnp.reshape(b3, (-1,)).astype(jnp.float32), (L.lanes,)))
    return packed, L


def _choose_tile(batch, batch_tile):
    """Return (tile_rows, padded_batch, compact_output)."""
    if batch < 128:
        tb = _align8(batch)
        return tb, tb, False
    # Large batch: tiles are multiples of 128 so each step emits a compact
    # lane-dense output block (one value per lane, no 128x replication).
    tb = min(_ceil_to(batch, 128), max(128, (batch_tile // 128) * 128))
    b_pad = _ceil_to(batch, tb)
    # Keep >=2 "parallel" grid steps when batch allows -> both TCs on v7x.
    if b_pad // tb < 2 and b_pad >= 256:
        tb = max(128, ((b_pad // 2) // 128) * 128)
        b_pad = _ceil_to(batch, tb)
    return tb, b_pad, True


def _build_kernel(layout, compact):
    """All offsets/dims are Python ints -> purely static slices inside."""
    lanes, k_in = layout.lanes, layout.k_in
    off_wg, off_w1, off_w2, off_w3, off_b = (
        layout.off_wg, layout.off_w1, layout.off_w2, layout.off_w3, layout.off_b)

    def kernel(x_ref, p_ref, out_ref):
        x = x_ref[...]                                         # [tb, k_in]

        # --- GCN, pre-fused into one 2D matmul; bias folded via ones column ---
        w_g = p_ref[off_wg:off_wg + k_in, :]                   # [k_in, lanes]
        flat = jnp.maximum(
            jnp.dot(x, w_g, preferred_element_type=jnp.float32), 0.0)

        # --- v_net MLP (all layers zero-padded to full lane width) ---
        w1 = p_ref[off_w1:off_w1 + lanes, :]
        b1 = p_ref[off_b + 0:off_b + 1, :]
        h1 = jnp.tanh(jnp.dot(flat, w1, preferred_element_type=jnp.float32) + b1)

        w2 = p_ref[off_w2:off_w2 + lanes, :]
        b2 = p_ref[off_b + 1:off_b + 2, :]
        h2 = jnp.tanh(jnp.dot(h1, w2, preferred_element_type=jnp.float32) + b2)

        w3 = p_ref[off_w3:off_w3 + lanes, :]                   # lane-tiled final weight
        b3 = p_ref[off_b + 2:off_b + 3, :]
        v = jnp.dot(h2, w3, preferred_element_type=jnp.float32) + b3
        # v: [tb, lanes], every lane holds the same per-row value.

        if compact:
            # Compact lane-dense store: one scalar per batch row.
            # out_ref block is [1, tb//128, 128]; pick the diagonal of each
            # 128-row group via mask + lane reduce (no unsupported relayouts).
            n_sub = out_ref.shape[1]
            v4 = v.reshape(1, n_sub, 128, lanes)
            row = jax.lax.broadcasted_iota(jnp.int32, (128, lanes), 0)
            col = jax.lax.broadcasted_iota(jnp.int32, (128, lanes), 1)
            eye = (row == col).astype(jnp.float32)
            out_ref[...] = jnp.sum(v4 * eye, axis=-1)          # [1, n_sub, 128]
        else:
            # Small-batch path: replicated full-lane store (unmasked vst);
            # wrapper reads column 0.
            out_ref[...] = v[:, :out_ref.shape[-1]]

    return kernel


def gcn_critic_forward(obs, packed, layout, *, batch_tile=1024):
    """Value estimate of shape [B]  (== torch.squeeze(v_net(GCN(obs)), -1))."""
    batch = obs.shape[0]
    L = layout

    # Flatten obs, append the ones column (folded GCN bias), pad cols to k_in.
    x = obs.reshape(batch, -1).astype(jnp.float32)
    x = jnp.concatenate([x, jnp.ones((batch, 1), jnp.float32)], axis=1)
    if x.shape[1] < L.k_in:
        x = jnp.pad(x, ((0, 0), (0, L.k_in - x.shape[1])))

    tb, b_pad, compact = _choose_tile(batch, batch_tile)
    if b_pad != batch:
        x = jnp.pad(x, ((0, b_pad - batch), (0, 0)))

    kernel = _build_kernel(L, compact)
    grid = (b_pad // tb,)

    if compact:
        out_shape = jax.ShapeDtypeStruct((b_pad // tb, tb // 128, 128), jnp.float32)
        out_spec = pl.BlockSpec((1, tb // 128, 128), lambda i: (i, 0, 0))
    else:
        out_shape = jax.ShapeDtypeStruct((b_pad, 128), jnp.float32)
        out_spec = pl.BlockSpec((tb, 128), lambda i: (i, 0))

    out = pl.pallas_call(
        kernel,
        out_shape=out_shape,
        grid=grid,
        in_specs=[
            pl.BlockSpec((tb, L.k_in), lambda i: (i, 0)),          # obs batch tile
            pl.BlockSpec((L.n_rows, L.lanes), lambda i: (0, 0)),   # packed params (resident)
        ],
        out_specs=out_spec,
        compiler_params=pltpu.CompilerParams(
            dimension_semantics=("parallel",)),
    )(x, packed)

    if compact:
        return out.reshape(-1)[:batch]
    return out[:batch, 0]


# ---------------------------------------------------------------------------
# Deterministic synthetic parameters / adjacency / pure-JAX reference
# ---------------------------------------------------------------------------
def make_params(key):
    """Deterministic synthetic parameters (shapes implied by __init__)."""
    ks = jax.random.split(key, 8)
    flat_dim = F_OUT * N_NODES

    def lin(k, fan_in, fan_out):
        kw, kb = jax.random.split(k)
        bound = 1.0 / jnp.sqrt(fan_in)
        w = jax.random.uniform(kw, (fan_in, fan_out), jnp.float32, -bound, bound)
        b = jax.random.uniform(kb, (1, fan_out), jnp.float32, -bound, bound)
        return w, b

    wg, bg = lin(ks[0], F_IN, F_OUT)               # GCN weight / bias
    w1, b1 = lin(ks[1], flat_dim, HIDDEN[0])       # v_net layer 1
    w2, b2 = lin(ks[2], HIDDEN[0], HIDDEN[1])      # v_net layer 2
    w3, b3 = lin(ks[3], HIDDEN[1], 1)              # v_net output layer
    return (wg, bg, w1, b1, w2, b2, w3, b3)


def make_adjacency(n):
    """Normalized ring-graph adjacency A_hat = D^-1/2 (A + I) D^-1/2."""
    a = jnp.zeros((n, n), jnp.float32)
    idx = jnp.arange(n)
    a = a.at[idx, (idx + 1) % n].set(1.0)
    a = a.at[(idx + 1) % n, idx].set(1.0)
    a = a + jnp.eye(n, dtype=jnp.float32)
    d = jnp.sum(a, axis=1)
    d_inv_sqrt = 1.0 / jnp.sqrt(d)
    return a * d_inv_sqrt[:, None] * d_inv_sqrt[None, :]


def reference_forward(obs, adj, params):
    """Pure-JAX reference with the original (unfused) GCN + MLP math."""
    wg, bg, w1, b1, w2, b2, w3, b3 = params
    h = jnp.maximum(jnp.einsum('nm,bmf->bnf', adj, obs) @ wg + bg, 0.0)
    flat = h.reshape(h.shape[0], -1)
    h1 = jnp.tanh(flat @ w1 + b1)
    h2 = jnp.tanh(h1 @ w2 + b2)
    return jnp.squeeze(h2 @ w3 + b3, -1)


if __name__ == "__main__":
    key = jax.random.PRNGKey(0)
    k_obs, k_params, k_obs_big = jax.random.split(key, 3)

    adj = make_adjacency(N_NODES)
    params = make_params(k_params)

    # Parameter prep runs once per weight update (cached), not per forward.
    packed, layout = pack_params(adj, params)
    packed = jax.block_until_ready(packed)

    # --- Small demo batch (module-sized): replicated-lane output path ---
    obs = jax.random.normal(k_obs, (B, N_NODES, F_IN), jnp.float32)
    v = jax.block_until_ready(gcn_critic_forward(obs, packed, layout))
    v_ref = reference_forward(obs, adj, params)
    assert v.shape == (B,)
    assert jnp.allclose(v, v_ref, atol=1e-4, rtol=1e-4), (v, v_ref)

    # --- Larger batch: exercises the compact lane-dense output store and a
    #     multi-step "parallel" grid (>=2 steps -> both TensorCores on v7x) ---
    big_b = 300
    obs_big = jax.random.normal(k_obs_big, (big_b, N_NODES, F_IN), jnp.float32)
    v_big = jax.block_until_ready(gcn_critic_forward(obs_big, packed, layout))
    v_big_ref = reference_forward(obs_big, adj, params)
    assert v_big.shape == (big_b,)
    assert jnp.allclose(v_big, v_big_ref, atol=1e-4, rtol=1e-4)

    print("KERNEL_OK")
</pallas_src>

<mosaic_0001>
module attributes {stable_mosaic.version = 11 : i64} {
  func.func @kernel(%arg0: i32, %arg1: memref<8x40xf32, #tpu.memory_space<vmem>>, %arg2: memref<432x128xf32, #tpu.memory_space<vmem>>, %arg3: memref<8x128xf32, #tpu.memory_space<vmem>>) attributes {dimension_semantics = [#tpu.dimension_semantics<parallel>], iteration_bounds = array<i64: 1>, scalar_prefetch = 0 : i64, scratch_operands = 0 : i64, tpu.core_type = #tpu.core_type<tc>, window_params = [{transform_indices = @transform_0, window_bounds = array<i64: 8, 40>}, {pipeline_mode = #tpu.pipeline_mode<synchronous>, transform_indices = @transform_1, window_bounds = array<i64: 432, 128>}, {transform_indices = @transform_2, window_bounds = array<i64: 8, 128>}]} {
    %c0 = arith.constant 0 : index
    %c0_0 = arith.constant 0 : index
    %0 = vector.load %arg1[%c0, %c0_0] : memref<8x40xf32, #tpu.memory_space<vmem>>, vector<8x40xf32>
    %c0_1 = arith.constant 0 : index
    %c0_2 = arith.constant 0 : index
    %1 = vector.load %arg2[%c0_1, %c0_2] : memref<432x128xf32, #tpu.memory_space<vmem>>, vector<40x128xf32>
    %cst = arith.constant dense<0.000000e+00> : vector<8x128xf32>
    %2 = tpu.matmul %0, %1, %cst {dimension_numbers = #tpu.dot_dimension_numbers<[1], [0], [0], [1], [0, 0, 1, 1], [], []>} : vector<8x40xf32>, vector<40x128xf32>, vector<8x128xf32> -> vector<8x128xf32>
    %cst_3 = arith.constant 0.000000e+00 : f32
    %3 = vector.broadcast %cst_3 : f32 to vector<8x128xf32>
    %4 = arith.maximumf %2, %3 : vector<8x128xf32>
    %c40 = arith.constant 40 : index
    %c0_4 = arith.constant 0 : index
    %5 = vector.load %arg2[%c40, %c0_4] : memref<432x128xf32, #tpu.memory_space<vmem>>, vector<128x128xf32>
    %c424 = arith.constant 424 : index
    %c0_5 = arith.constant 0 : index
    %6 = vector.load %arg2[%c424, %c0_5] : memref<432x128xf32, #tpu.memory_space<vmem>>, vector<1x128xf32>
    %cst_6 = arith.constant dense<0.000000e+00> : vector<8x128xf32>
    %7 = tpu.matmul %4, %5, %cst_6 {dimension_numbers = #tpu.dot_dimension_numbers<[1], [0], [0], [1], [0, 0, 1, 1], [], []>} : vector<8x128xf32>, vector<128x128xf32>, vector<8x128xf32> -> vector<8x128xf32>
    %8 = vector.broadcast %6 : vector<1x128xf32> to vector<8x128xf32>
    %9 = arith.addf %7, %8 : vector<8x128xf32>
    %10 = math.tanh %9 : vector<8x128xf32>
    %c168 = arith.constant 168 : index
    %c0_7 = arith.constant 0 : index
    %11 = vector.load %arg2[%c168, %c0_7] : memref<432x128xf32, #tpu.memory_space<vmem>>, vector<128x128xf32>
    %c425 = arith.constant 425 : index
    %c0_8 = arith.constant 0 : index
    %12 = vector.load %arg2[%c425, %c0_8] : memref<432x128xf32, #tpu.memory_space<vmem>>, vector<1x128xf32>
    %cst_9 = arith.constant dense<0.000000e+00> : vector<8x128xf32>
    %13 = tpu.matmul %10, %11, %cst_9 {dimension_numbers = #tpu.dot_dimension_numbers<[1], [0], [0], [1], [0, 0, 1, 1], [], []>} : vector<8x128xf32>, vector<128x128xf32>, vector<8x128xf32> -> vector<8x128xf32>
    %14 = vector.broadcast %12 : vector<1x128xf32> to vector<8x128xf32>
    %15 = arith.addf %13, %14 : vector<8x128xf32>
    %16 = math.tanh %15 : vector<8x128xf32>
    %c296 = arith.constant 296 : index
    %c0_10 = arith.constant 0 : index
    %17 = vector.load %arg2[%c296, %c0_10] : memref<432x128xf32, #tpu.memory_space<vmem>>, vector<128x128xf32>
    %c426 = arith.constant 426 : index
    %c0_11 = arith.constant 0 : index
    %18 = vector.load %arg2[%c426, %c0_11] : memref<432x128xf32, #tpu.memory_space<vmem>>, vector<1x128xf32>
    %cst_12 = arith.constant dense<0.000000e+00> : vector<8x128xf32>
    %19 = tpu.matmul %16, %17, %cst_12 {dimension_numbers = #tpu.dot_dimension_numbers<[1], [0], [0], [1], [0, 0, 1, 1], [], []>} : vector<8x128xf32>, vector<128x128xf32>, vector<8x128xf32> -> vector<8x128xf32>
    %20 = vector.broadcast %18 : vector<1x128xf32> to vector<8x128xf32>
    %21 = arith.addf %19, %20 : vector<8x128xf32>
    %c0_13 = arith.constant 0 : index
    %c0_14 = arith.constant 0 : index
    %22 = vector.load %arg3[%c0_13, %c0_14] : memref<8x128xf32, #tpu.memory_space<vmem>>, vector<8x128xf32>
    tpu.vector_store %arg3[%c0_13, %c0_14], %21 {strides = array<i32>} : memref<8x128xf32, #tpu.memory_space<vmem>>, vector<8x128xf32>,
    return
  }
  func.func @transform_0(%arg0: i32) -> (i32, i32) {
    %c0_i32 = arith.constant 0 : i32
    %c0_i32_0 = arith.constant 0 : i32
    return %arg0, %c0_i32 : i32, i32
  }
  func.func @transform_1(%arg0: i32) -> (i32, i32) {
    %c0_i32 = arith.constant 0 : i32
    %c0_i32_0 = arith.constant 0 : i32
    %c0_i32_1 = arith.constant 0 : i32
    return %c0_i32, %c0_i32_0 : i32, i32
  }
  func.func @transform_2(%arg0: i32) -> (i32, i32) {
    %c0_i32 = arith.constant 0 : i32
    %c0_i32_0 = arith.constant 0 : i32
    return %arg0, %c0_i32 : i32, i32
  }
}

</mosaic_0001>

<bundles_post_ra>
// kernel: tpu_custom_call.1
= control target key start
LH: loop header
LB: loop body
LE: loop exit
PB: predicated region body
PF: predicated region fallthrough
CT: control target
= control target key end

     0   :  { %7 = vsyncpa [#allocation3], 0  ;;  %s328_s0 = inlined_call_operand.hbm [shape: f32[8,40], index: 0, kind: input, shape index: {}]   ;;  %s329_s1 = inlined_call_operand.hbm [shape: f32[432,128], index: 1, kind: input, shape index: {}]   ;;  %s330_s2 = inlined_call_operand.hbm [shape: f32[8,128], index: 2, kind: output, shape index: {}]  }
   0x1   :  { %8 = vsyncpa [#allocation6], 0 }
   0x2   :  { %9 = vsyncpa [#allocation4], 0  ;;  %s15_s11 = sshll.u32 %s328_s0, 4  ;;  %s299_s12 = smov [#allocation2]   ;;  %s16_s11 = int_to_ptr.hbm [resolvable:$true] %s15_s11 }
   0x3   :  { %s17_s13 = sshll.u32 %s299_s12, 4  ;;  %s25_s16 = sshll.u32 %s329_s1, 4  ;;  %s18_s13 = int_to_ptr.vmem [resolvable:$true] %s17_s13  ;;  %s26_s16 = int_to_ptr.hbm [resolvable:$true] %s25_s16 }
   0x4   :  { %20 = dma.hbm_to_vmem [thread:$0]  %s16_s11, 128, %s18_s13, [#allocation3]  }
   0x5   :  { %s300_s17 = smov [#allocation5]   ;;  %s301_s19 = smov 128  }
   0x6   :  { %s27_s18 = sshll.u32 %s300_s17, 4  ;;  %s302_s20 = smov 8   ;;  %s28_s18 = int_to_ptr.vmem [resolvable:$true] %s27_s18 }
   0x7   :  { %33 = dma.hbm_to_vmem [thread:$0]  %s26_s16, 6912, %s28_s18, [#allocation6], %s301_s19, %s301_s19, %s302_s20  }
   0x8   :  { %293 = dma.done.wait [#allocation3], 128  }
   0x9   :  { %294 = vsyncadd [#allocation3], 4294967168 }
   0xa   :  { %295 = dma.done.wait [#allocation6], 6912  }
   0xb   :  { %296 = vsyncadd [#allocation6], 4294960384  ;;  %v47_v0 = vld [vmem:[#allocation5 + $0x20] sm:$0xff]  ;;  %v46_v1 = vld [vmem:[#allocation5 + $0x18] sm:$0xff]  ;;  %vm48_vm0 = vcmask 326656   ;;  %s303_s0 = smov [#allocation7]  }
   0xc   :  { %63 = vmatpush.msra.mxu0 %v47_v0  ;;  %v45_v2 = vld [vmem:[#allocation5 + $0x10] sm:$0xff]  ;;  %v88_v3 = vld [vmem:[#allocation5 + $0xa0] sm:$0xff]  ;;  %v87_v4 = vld [vmem:[#allocation5 + $0x98] sm:$0xff]  ;;  %s195_s1 = sshll.u32 %s303_s0, 4  ;;  %s197_s23 = sshll.u32 %s330_s2, 4  ;;  %s196_s1 = int_to_ptr.vmem [resolvable:$true] %s195_s1  ;;  %s198_s23 = int_to_ptr.hbm [resolvable:$true] %s197_s23 }
   0xd   :  { %91 = vmatpush.msra.mxu1 %v88_v3  ;;  %v44_v5 = vld [vmem:[#allocation5 + $0x8] sm:$0xff]  ;;  %v86_v6 = vld [vmem:[#allocation5 + $0x90] sm:$0xff]  ;;  %v43_v7 = vld [vmem:[#allocation5] sm:$0xff] }
   0xe   :  { %64 = vmatpush.msra.mxu0 %v46_v1  ;;  %v85_v8 = vld [vmem:[#allocation5 + $0x88] sm:$0xff]  ;;  %v42_v9 = vld [vmem:[#allocation2] sm:$0xff]  ;;  %v84_v10 = vld [vmem:[#allocation5 + $0x80] sm:$0xff] }
   0xf   :  { %92 = vmatpush.msra.mxu1 %v87_v4  ;;  %v83_v11 = vld [vmem:[#allocation5 + $0x78] sm:$0xff]  ;;  %v82_v12 = vld [vmem:[#allocation5 + $0x70] sm:$0xff]  ;;  %v81_v13 = vld [vmem:[#allocation5 + $0x68] sm:$0xff] }
  0x10   :  { %65 = vmatpush.msra.mxu0 %v45_v2  ;;  %v80_v14 = vld [vmem:[#allocation5 + $0x60] sm:$0xff]  ;;  %v79_v15 = vld [vmem:[#allocation5 + $0x58] sm:$0xff]  ;;  %v78_v16 = vld [vmem:[#allocation5 + $0x50] sm:$0xff] }
  0x11   :  { %93 = vmatpush.msra.mxu1 %v86_v6  ;;  %v77_v17 = vld [vmem:[#allocation5 + $0x48] sm:$0xff]  ;;  %v76_v18 = vld [vmem:[#allocation5 + $0x40] sm:$0xff]  ;;  %v75_v19 = vld [vmem:[#allocation5 + $0x38] sm:$0xff] }
  0x12   :  { %66 = vmatpush.msra.mxu0 %v44_v5  ;;  %v74_v20 = vld [vmem:[#allocation5 + $0x30] sm:$0xff]  ;;  %v73_v21 = vld [vmem:[#allocation5 + $0x28] sm:$0xff]  ;;  %v127_v22 = vld [vmem:[#allocation5 + $0x120] sm:$0xff] }
  0x13   :  { %94 = vmatpush.msra.mxu1 %v85_v8  ;;  %v126_v23 = vld [vmem:[#allocation5 + $0x118] sm:$0xff]  ;;  %130 = vmatpush.msra.mxu2 %v127_v22  ;;  %v125_v24 = vld [vmem:[#allocation5 + $0x110] sm:$0xff]  ;;  %v124_v25 = vld [vmem:[#allocation5 + $0x108] sm:$0xff] }
  0x14   :  { %67 = vmatpush.msra.mxu0 %v43_v7  ;;  %v123_v26 = vld [vmem:[#allocation5 + $0x100] sm:$0xff]  ;;  %v122_v27 = vld [vmem:[#allocation5 + $0xf8] sm:$0xff]  ;;  %v121_v28 = vld [vmem:[#allocation5 + $0xf0] sm:$0xff] }
  0x15   :  { %208 = vmatmul.msk.f32.vlgmr.msra.gmra.mxu0 %vm48_vm0, %v42_v9  ;;  %95 = vmatpush.msra.mxu1 %v84_v10  ;;  %v120_v29 = vld [vmem:[#allocation5 + $0xe8] sm:$0xff]  ;;  %v119_v30 = vld [vmem:[#allocation5 + $0xe0] sm:$0xff]  ;;  %v118_v31 = vld [vmem:[#allocation5 + $0xd8] sm:$0xff] }
  0x16   :  { %131 = vmatpush.msra.mxu2 %v126_v23  ;;  %v117_v32 = vld [vmem:[#allocation5 + $0xd0] sm:$0xff]  ;;  %v116_v35 = vld [vmem:[#allocation5 + $0xc8] sm:$0xff]  ;;  %v115_v36 = vld [vmem:[#allocation5 + $0xc0] sm:$0xff] }
  0x17   :  { %96 = vmatpush.msra.mxu1 %v83_v11  ;;  %v114_v37 = vld [vmem:[#allocation5 + $0xb8] sm:$0xff]  ;;  %v113_v38 = vld [vmem:[#allocation5 + $0xb0] sm:$0xff]  ;;  %v112_v39 = vld [vmem:[#allocation5 + $0xa8] sm:$0xff] }
  0x18   :  { %132 = vmatpush.msra.mxu2 %v125_v24  ;;  %v166_v40 = vld [vmem:[#allocation5 + $0x1a0] sm:$0xff]  ;;  %v165_v41 = vld [vmem:[#allocation5 + $0x198] sm:$0xff]  ;;  %v164_v42 = vld [vmem:[#allocation5 + $0x190] sm:$0xff] }
  0x19   :  { %97 = vmatpush.msra.mxu1 %v82_v12  ;;  %169 = vmatpush.msra.mxu3 %v166_v40  ;;  %v163_v43 = vld [vmem:[#allocation5 + $0x188] sm:$0xff]  ;;  %v162_v44 = vld [vmem:[#allocation5 + $0x180] sm:$0xff]  ;;  %v161_v45 = vld [vmem:[#allocation5 + $0x178] sm:$0xff] }
  0x1a   :  { %133 = vmatpush.msra.mxu2 %v124_v25  ;;  %v160_v46 = vld [vmem:[#allocation5 + $0x170] sm:$0xff]  ;;  %v159_v47 = vld [vmem:[#allocation5 + $0x168] sm:$0xff]  ;;  %v158_v48 = vld [vmem:[#allocation5 + $0x160] sm:$0xff] }
  0x1b   :  { %98 = vmatpush.msra.mxu1 %v81_v13  ;;  %170 = vmatpush.msra.mxu3 %v165_v41  ;;  %v157_v49 = vld [vmem:[#allocation5 + $0x158] sm:$0xff]  ;;  %v156_v50 = vld [vmem:[#allocation5 + $0x150] sm:$0xff]  ;;  %v214_v51 = vld [vmem:[#allocation5 + $0x1a8] ss:$0 sm:$0xff] }
  0x1c   :  { %134 = vmatpush.msra.mxu2 %v123_v26  ;;  %v155_v55 = vld [vmem:[#allocation5 + $0x148] sm:$0xff]  ;;  %v154_v56 = vld [vmem:[#allocation5 + $0x140] sm:$0xff]  ;;  %v153_v57 = vld [vmem:[#allocation5 + $0x138] sm:$0xff] }
  0x1d   :  { %99 = vmatpush.msra.mxu1 %v80_v14  ;;  %171 = vmatpush.msra.mxu3 %v164_v42  ;;  %v152_v58 = vld [vmem:[#allocation5 + $0x130] sm:$0xff]  ;;  %v151_v59 = vld [vmem:[#allocation5 + $0x128] sm:$0xff] }
  0x1e   :  { %135 = vmatpush.msra.mxu2 %v122_v27  ;;  %v215_v60 = vld [vmem:[#allocation5 + $0x1a9] ss:$0 sm:$0xff]  ;;  %v216_v0 = vld [vmem:[#allocation5 + $0x1aa] ss:$0 sm:$0xff] }
  0x1f   :  { %100 = vmatpush.msra.mxu1 %v79_v15  ;;  %172 = vmatpush.msra.mxu3 %v163_v43 }
  0x20   :  { %136 = vmatpush.msra.mxu2 %v121_v28 }
  0x21   :  { %101 = vmatpush.msra.mxu1 %v78_v16  ;;  %173 = vmatpush.msra.mxu3 %v162_v44 }
  0x22   :  { %137 = vmatpush.msra.mxu2 %v120_v29 }
  0x23   :  { %102 = vmatpush.msra.mxu1 %v77_v17  ;;  %174 = vmatpush.msra.mxu3 %v161_v45 }
  0x24   :  { %138 = vmatpush.msra.mxu2 %v119_v30 }
  0x25   :  { %103 = vmatpush.msra.mxu1 %v76_v18  ;;  %175 = vmatpush.msra.mxu3 %v160_v46 }
  0x26   :  { %139 = vmatpush.msra.mxu2 %v118_v31 }
  0x27   :  { %104 = vmatpush.msra.mxu1 %v75_v19  ;;  %176 = vmatpush.msra.mxu3 %v159_v47 }
  0x28   :  { %140 = vmatpush.msra.mxu2 %v117_v32 }
  0x29   :  { %105 = vmatpush.msra.mxu1 %v74_v20  ;;  %177 = vmatpush.msra.mxu3 %v158_v48 }
  0x2a   :  { %141 = vmatpush.msra.mxu2 %v116_v35 }
  0x2b   :  { %106 = vmatpush.msra.mxu1 %v73_v21  ;;  %178 = vmatpush.msra.mxu3 %v157_v49 }
  0x2c   :  { %142 = vmatpush.msra.mxu2 %v115_v36 }
  0x2d   :  { %179 = vmatpush.msra.mxu3 %v156_v50 }
  0x2e   :  { %143 = vmatpush.msra.mxu2 %v114_v37 }
  0x2f   :  { %180 = vmatpush.msra.mxu3 %v155_v55 }
  0x30   :  { %144 = vmatpush.msra.mxu2 %v113_v38 }
  0x31   :  { %181 = vmatpush.msra.mxu3 %v154_v56 }
  0x32   :  { %145 = vmatpush.msra.mxu2 %v112_v39 }
  0x33   :  { %182 = vmatpush.msra.mxu3 %v153_v57 }
  0x35   :  { %183 = vmatpush.msra.mxu3 %v152_v58 }
  0x37   :  { %184 = vmatpush.msra.mxu3 %v151_v59 }
  0x92   :  { %v69_v33 = vpop.f32.mrf.mxu0 }
  0x93   :  { %v72_v34 = vmax.f32 %v69_v33, 0.0 }
  0x95   :  { %107 = vmatmul.f32.vlgmr.msra.gmra.mxu1 %v72_v34 }
 0x112   :  { %v108_v52 = vpop.f32.mrf.mxu1 }
 0x113   :  { %v109_v53 = vadd.f32 %v214_v51, %v108_v52 }
 0x115   :  { %217 = vtanh.f32 %v109_v53 }
 0x11b   :  { %v218_v54 = vpop.eup %217 }
 0x11c   :  { %146 = vmatmul.f32.vlgmr.msra.gmra.mxu2 %v218_v54 }
 0x19f   :  { %v147_v61 = vpop.f32.mrf.mxu2 }
 0x1a0   :  { %v148_v62 = vadd.f32 %v215_v60, %v147_v61 }
 0x1a2   :  { %219 = vtanh.f32 %v148_v62 }
 0x1a8   :  { %v220_v63 = vpop.eup %219 }
 0x1a9   :  { %185 = vmatmul.f32.vlgmr.msra.gmra.mxu3 %v220_v63 }
 0x22c   :  { %v186_v1 = vpop.f32.mrf.mxu3 }
 0x22d   :  { %v187_v2 = vadd.f32 %v216_v0, %v186_v1 }
 0x22f   :  { %189 = vst [vmem:[#allocation7] sm:$0xff] %v187_v2 }
 0x230   :  { %200 = dma.vmem_to_hbm [thread:$0]  %s196_s1, 128, %s198_s23, [#allocation4]  }
 0x231   :  { %297 = dma.done.wait [#allocation4], 128  }
 0x232   :  { %298 = vsyncadd [#allocation4], 4294967168 }
 0x233   :  { %205 = vsyncpa [#allocation3], 1 }
 0x234   :  { %206 = vsyncpa [#allocation6], 1 }
 0x235   :  { %207 = vsyncpa [#allocation4], 1 }

</bundles_post_ra>
